<compile_context>
chip_gen: v5e
topology: v5e:2x2
jax: 0.10.0
libtpu: 0.0.40
codegen_flags: <defaults>
</compile_context>

<pallas_src>
import numpy as np
import jax
import jax.numpy as jnp
from jax.experimental import pallas as pl
from jax.experimental.pallas import tpu as pltpu


def _cdiv(a, b):
    return -(-a // b)


def _round_up(a, b):
    return _cdiv(a, b) * b


# ---------------------------------------------------------------------------
# Streaming kernel: per-sample sum of squared errors.
#   sse[b] = sum_m (x[b, m] - y[b, m])**2
# Grid = (batch row-blocks [parallel], feature col-blocks [arbitrary/reduce]);
# the (TILE_B, 1) output block is resident across the reduce axis.
# ---------------------------------------------------------------------------
def _make_sse_kernel(M, TILE_M):
    ragged_cols = (M % TILE_M) != 0

    def kernel(x_ref, y_ref, o_ref):
        j = pl.program_id(1)

        # Upcast in-kernel (inputs may be bf16); VPU work hidden under DMA.
        diff = x_ref[...].astype(jnp.float32) - y_ref[...].astype(jnp.float32)
        if ragged_cols:
            # Mask the ragged column tail instead of padding in the wrapper.
            col = jax.lax.broadcasted_iota(jnp.int32, diff.shape, 1) + j * TILE_M
            diff = jnp.where(col < M, diff, 0.0)
        part = jnp.sum(diff * diff, axis=1, keepdims=True)        # (TILE_B, 1)

        @pl.when(j == 0)
        def _init():
            o_ref[...] = jnp.zeros_like(o_ref)

        o_ref[...] += part

    return kernel


# ---------------------------------------------------------------------------
# One-shot covariance-regularizer kernel (hoisted out of the streaming loop).
# mask_ref already carries alpha / (N-1)^2, so the output equals
#   alpha * sum_groups sum_{i != j in group} cov(latents)_{ij}^2
# ---------------------------------------------------------------------------
def _cov_kernel(lat_ref, mask_ref, out_ref):
    lat = lat_ref[...].astype(jnp.float32)                        # (N, D)
    mu = jnp.mean(lat, axis=0, keepdims=True)                     # (1, D)
    xc = lat - mu
    gram = jnp.einsum("nd,ne->de", xc, xc,
                      preferred_element_type=jnp.float32)         # (D, D)
    out_ref[...] = jnp.sum(mask_ref[...] * gram * gram, keepdims=True)


def regularized_latents_mse_loss2(
    outputs, latents, target, *, alpha, indices_dict, sample_weights=None
):
    """JAX/Pallas equivalent of RegularizedLatentsMSELoss2.forward."""
    outputs = jnp.asarray(outputs)      # keep native dtype (bf16 streams as bf16)
    target = jnp.asarray(target)
    latents = jnp.asarray(latents)

    B, C, T = outputs.shape
    N, D = latents.shape
    M = C * T

    if sample_weights is None:
        w = jnp.ones((B,), dtype=jnp.float32)
    else:
        w = jnp.asarray(sample_weights, jnp.float32).reshape(B)

    # ---- generation-aware tile sizing --------------------------------------
    try:
        vmem_cap = int(pltpu.get_tpu_info().vmem_capacity_bytes)
    except Exception:
        vmem_cap = 64 << 20                       # conservative: v7x per-core VMEM
    target_block_bytes = (8 << 20) if vmem_cap >= (96 << 20) else (4 << 20)

    itemsize = max(outputs.dtype.itemsize, target.dtype.itemsize)
    target_block_elems = max(target_block_bytes // itemsize, 8 * 128)

    MAX_TILE_M = 32768                            # cap on lane extent of a block
    TILE_M = M if M <= MAX_TILE_M else MAX_TILE_M   # full-extent or multiple of 128
    num_m_blocks = _cdiv(M, TILE_M)

    rows_target = max(8, target_block_elems // TILE_M)
    if B >= 16:
        # keep >=2 row-blocks so the leading "parallel" axis can be split
        # across both TensorCores on v7x (harmless extra step on v5e/v6e)
        rows_target = min(rows_target, _round_up(_cdiv(B, 2), 8))
    if B <= rows_target:
        TILE_B = B                                # full-extent: always layout-legal
    else:
        TILE_B = max(8, (rows_target // 8) * 8)   # sublane-aligned row tile
    num_b_blocks = _cdiv(B, TILE_B)
    B_pad = num_b_blocks * TILE_B                 # ragged tail rows discarded below

    # Double-buffered input streams + lane-padded output block + headroom.
    in_block_bytes = TILE_B * TILE_M * (outputs.dtype.itemsize + target.dtype.itemsize)
    out_block_bytes = TILE_B * 128 * 4
    vmem_limit = int(
        min(max(2 * in_block_bytes + 2 * out_block_bytes + (4 << 20), 16 << 20),
            48 << 20)
    )

    sse_kernel = _make_sse_kernel(M, TILE_M)

    # ---- static group mask with alpha and 1/(N-1)^2 folded in --------------
    mask_np = np.zeros((D, D), dtype=np.float64)
    for _, indices in indices_dict.items():
        if len(indices) > 1:
            for gi in indices:
                for gj in indices:
                    if gi != gj:
                        mask_np[gi, gj] += 1.0
    denom = max(N - 1, 1)                         # guard the degenerate N == 1 case
    mask_scaled = jnp.asarray(mask_np * (float(alpha) / float(denom * denom)),
                              jnp.float32)

    inv_n_elems = 1.0 / float(B * C * T)

    @jax.jit
    def _run(outputs, target, w, latents, mask_scaled):
        # Copy-free lane-dense 2D views (contiguous reshape -> bitcast under jit;
        # no host-side padding passes over HBM).
        x2d = outputs.reshape(B, M)
        y2d = target.reshape(B, M)

        sse_rows = pl.pallas_call(
            sse_kernel,
            out_shape=jax.ShapeDtypeStruct((B_pad, 1), jnp.float32),
            grid=(num_b_blocks, num_m_blocks),
            in_specs=[
                pl.BlockSpec((TILE_B, TILE_M), lambda i, j: (i, j)),
                pl.BlockSpec((TILE_B, TILE_M), lambda i, j: (i, j)),
            ],
            out_specs=pl.BlockSpec((TILE_B, 1), lambda i, j: (i, 0)),
            compiler_params=pltpu.CompilerParams(
                dimension_semantics=("parallel", "arbitrary"),
                vmem_limit_bytes=vmem_limit,
            ),
        )(x2d, y2d)

        # TODO(synk): if N or D ever grows beyond small sizes, tile the centered
        # Gram over N instead of a single whole-array invocation.
        cov_term = pl.pallas_call(
            _cov_kernel,
            out_shape=jax.ShapeDtypeStruct((1, 1), jnp.float32),
        )(latents, mask_scaled)[0, 0]

        # Tiny epilogue: per-sample weights applied to per-sample SSE (B values),
        # mean denominator, and the regularizer add.
        sse = sse_rows[:B, 0]
        return jnp.sum(sse * w) * inv_n_elems + cov_term

    return _run(outputs, target, w, latents, mask_scaled)


def _reference_numpy(outputs, latents, target, alpha, indices_dict, sample_weights=None):
    """Pure numpy reference mirroring the PyTorch forward."""
    outputs = np.asarray(outputs, np.float64)
    target = np.asarray(target, np.float64)
    latents = np.asarray(latents, np.float64)
    mse = (outputs - target) ** 2
    if sample_weights is not None:
        mse = mse * np.asarray(sample_weights, np.float64)[:, None, None]
    mse = mse.mean()
    cov_loss = 0.0
    lat_t = latents.T  # (D, N)
    for _, indices in indices_dict.items():
        if len(indices) > 1:
            c = np.cov(lat_t[np.array(indices)])  # ddof=1, matches torch.cov
            cov_loss += (c ** 2).sum() - (np.diag(c) ** 2).sum()
    return mse + alpha * cov_loss


if __name__ == "__main__":
    key = jax.random.PRNGKey(0)
    k1, k2, k3, k4 = jax.random.split(key, 4)

    B, C, T = 2, 4, 16      # outputs/target: (batch, channels, time)
    N, D = 16, 8            # latents: (observations, latent dims)

    outputs = jax.random.normal(k1, (B, C, T), dtype=jnp.float32)
    target = jax.random.normal(k2, (B, C, T), dtype=jnp.float32)
    latents = jax.random.normal(k3, (N, D), dtype=jnp.float32)
    sample_weights = jax.random.uniform(
        k4, (B,), dtype=jnp.float32, minval=0.5, maxval=1.5
    )

    alpha = 0.1
    indices_dict = {
        "tongue": [0, 1, 2],
        "lips": [3, 4],
        "jaw": [5],          # size-1 group -> skipped, as in the module
    }

    loss = regularized_latents_mse_loss2(
        outputs,
        latents,
        target,
        alpha=alpha,
        indices_dict=indices_dict,
        sample_weights=sample_weights,
    )
    loss = jax.block_until_ready(loss)

    ref = _reference_numpy(
        outputs, latents, target, alpha, indices_dict, sample_weights
    )
    np.testing.assert_allclose(np.asarray(loss), ref, rtol=1e-4, atol=1e-5)

    print("KERNEL_OK")
</pallas_src>

<mosaic_0001>
module attributes {stable_mosaic.version = 11 : i64} {
  func.func @_cov_kernel(%arg0: memref<16x8xf32, #tpu.memory_space<vmem>>, %arg1: memref<8x8xf32, #tpu.memory_space<vmem>>, %arg2: memref<1x1xf32, #tpu.memory_space<vmem>>) attributes {dimension_semantics = [], scalar_prefetch = 0 : i64, scratch_operands = 0 : i64, tpu.core_type = #tpu.core_type<tc>} {
    %c0 = arith.constant 0 : index
    %c0_0 = arith.constant 0 : index
    %0 = vector.load %arg0[%c0, %c0_0] : memref<16x8xf32, #tpu.memory_space<vmem>>, vector<16x8xf32>
    %cst = arith.constant dense<0.000000e+00> : vector<8xf32>
    %1 = vector.multi_reduction <add>, %0, %cst [0] : vector<16x8xf32> to vector<8xf32>
    %2 = vector.shape_cast %1 : vector<8xf32> to vector<1x8xf32>
    %cst_1 = arith.constant 1.600000e+01 : f32
    %3 = vector.broadcast %cst_1 : f32 to vector<1x8xf32>
    %4 = arith.divf %2, %3 : vector<1x8xf32>
    %5 = vector.broadcast %4 : vector<1x8xf32> to vector<16x8xf32>
    %6 = arith.subf %0, %5 : vector<16x8xf32>
    "tpu.trace_start"() <{level = 10 : i32, message = "nd,ne->de"}> : () -> ()
    %cst_2 = arith.constant dense<0.000000e+00> : vector<8x8xf32>
    %7 = tpu.matmul %6, %6, %cst_2 {dimension_numbers = #tpu.dot_dimension_numbers<[0], [0], [1], [1], [0, 1, 1, 1], [], []>} : vector<16x8xf32>, vector<16x8xf32>, vector<8x8xf32> -> vector<8x8xf32>
    "tpu.trace_stop"() : () -> ()
    %c0_3 = arith.constant 0 : index
    %c0_4 = arith.constant 0 : index
    %8 = vector.load %arg1[%c0_3, %c0_4] : memref<8x8xf32, #tpu.memory_space<vmem>>, vector<8x8xf32>
    %9 = arith.mulf %8, %7 : vector<8x8xf32>
    %10 = arith.mulf %9, %7 : vector<8x8xf32>
    %11 = vector.shape_cast %10 : vector<8x8xf32> to vector<1x8x8xf32>
    %cst_5 = arith.constant dense<0.000000e+00> : vector<1xf32>
    %12 = vector.multi_reduction <add>, %11, %cst_5 [1, 2] : vector<1x8x8xf32> to vector<1xf32>
    %13 = vector.shape_cast %12 : vector<1xf32> to vector<1x1x1xf32>
    %14 = vector.extract %13[0, 0, 0] : f32 from vector<1x1x1xf32>
    %15 = vector.broadcast %14 : f32 to vector<1x1xf32>
    %c0_6 = arith.constant 0 : index
    %c0_7 = arith.constant 0 : index
    %16 = vector.load %arg2[%c0_6, %c0_7] : memref<1x1xf32, #tpu.memory_space<vmem>>, vector<1x1xf32>
    tpu.vector_store %arg2[%c0_6, %c0_7], %15 {strides = array<i32>} : memref<1x1xf32, #tpu.memory_space<vmem>>, vector<1x1xf32>,
    return
  }
}

module attributes {stable_mosaic.version = 11 : i64} {
  func.func @kernel(%arg0: i32, %arg1: i32, %arg2: memref<2x64xf32, #tpu.memory_space<vmem>>, %arg3: memref<2x64xf32, #tpu.memory_space<vmem>>, %arg4: memref<2x1xf32, #tpu.memory_space<vmem>>) attributes {dimension_semantics = [#tpu.dimension_semantics<parallel>, #tpu.dimension_semantics<arbitrary>], iteration_bounds = array<i64: 1, 1>, scalar_prefetch = 0 : i64, scratch_operands = 0 : i64, tpu.core_type = #tpu.core_type<tc>, window_params = [{transform_indices = @transform_0, window_bounds = array<i64: 2, 64>}, {transform_indices = @transform_1, window_bounds = array<i64: 2, 64>}, {transform_indices = @transform_2, window_bounds = array<i64: 2, 1>}]} {
    %c0 = arith.constant 0 : index
    %c0_0 = arith.constant 0 : index
    %0 = vector.load %arg2[%c0, %c0_0] : memref<2x64xf32, #tpu.memory_space<vmem>>, vector<2x64xf32>
    %c0_1 = arith.constant 0 : index
    %c0_2 = arith.constant 0 : index
    %1 = vector.load %arg3[%c0_1, %c0_2] : memref<2x64xf32, #tpu.memory_space<vmem>>, vector<2x64xf32>
    %2 = arith.subf %0, %1 : vector<2x64xf32>
    %3 = arith.mulf %2, %2 : vector<2x64xf32>
    %cst = arith.constant dense<0.000000e+00> : vector<2xf32>
    %4 = vector.multi_reduction <add>, %3, %cst [1] : vector<2x64xf32> to vector<2xf32>
    %5 = vector.shape_cast %4 : vector<2xf32> to vector<2x1xf32>
    %c0_i32 = arith.constant 0 : i32
    %6 = arith.cmpi eq, %arg1, %c0_i32 : i32
    %7 = arith.extui %6 : i1 to i32
    %c0_i32_3 = arith.constant 0 : i32
    %8 = arith.cmpi ne, %7, %c0_i32_3 : i32
    scf.if %8 {
      %cst_8 = arith.constant 0.000000e+00 : f32
      %12 = vector.broadcast %cst_8 : f32 to vector<2x1xf32>
      %c0_9 = arith.constant 0 : index
      %c0_10 = arith.constant 0 : index
      %13 = vector.load %arg4[%c0_9, %c0_10] : memref<2x1xf32, #tpu.memory_space<vmem>>, vector<2x1xf32>
      tpu.vector_store %arg4[%c0_9, %c0_10], %12 {strides = array<i32>} : memref<2x1xf32, #tpu.memory_space<vmem>>, vector<2x1xf32>,
    } else {
    }
    %c0_4 = arith.constant 0 : index
    %c0_5 = arith.constant 0 : index
    %9 = vector.load %arg4[%c0_4, %c0_5] : memref<2x1xf32, #tpu.memory_space<vmem>>, vector<2x1xf32>
    %10 = arith.addf %9, %5 : vector<2x1xf32>
    %c0_6 = arith.constant 0 : index
    %c0_7 = arith.constant 0 : index
    %11 = vector.load %arg4[%c0_6, %c0_7] : memref<2x1xf32, #tpu.memory_space<vmem>>, vector<2x1xf32>
    tpu.vector_store %arg4[%c0_6, %c0_7], %10 {strides = array<i32>} : memref<2x1xf32, #tpu.memory_space<vmem>>, vector<2x1xf32>,
    return
  }
  func.func @transform_0(%arg0: i32, %arg1: i32) -> (i32, i32) {
    %c0_i32 = arith.constant 0 : i32
    return %arg0, %arg1 : i32, i32
  }
  func.func @transform_1(%arg0: i32, %arg1: i32) -> (i32, i32) {
    %c0_i32 = arith.constant 0 : i32
    return %arg0, %arg1 : i32, i32
  }
  func.func @transform_2(%arg0: i32, %arg1: i32) -> (i32, i32) {
    %c0_i32 = arith.constant 0 : i32
    %c0_i32_0 = arith.constant 0 : i32
    return %arg0, %c0_i32 : i32, i32
  }
}

</mosaic_0001>

<bundles_post_ra>
// kernel: _run.3
= control target key start
LH: loop header
LB: loop body
LE: loop exit
PB: predicated region body
PF: predicated region fallthrough
CT: control target
= control target key end

     0   :  { %vm14_vm0 = vcmask 64512   ;;  %v156_v4 = vmov 16.0   ;;  %s188_s0 = inlined_call_operand.vmem [shape: f32[16,8], index: 0, kind: input, shape index: {}]   ;;  %s189_s1 = inlined_call_operand.vmem [shape: f32[8,8], index: 1, kind: input, shape index: {}]   ;;  %s190_s2 = inlined_call_operand.hbm [shape: f32[1,1], index: 2, kind: output, shape index: {}]  }
   0x1   :  { %v12_v0 = vld [vmem:[%s188_s0] sm:$0xff]  ;;  %v13_v1 = vld [vmem:[%s188_s0 + $0x8] sm:$0xff]  ;;  %128 = vrcp.f32 %v156_v4 }
   0x2   :  { %v15_v2 = vsel %vm14_vm0, %v12_v0, 0.0  ;;  %v16_v3 = vsel %vm14_vm0, %v13_v1, 0.0 }
   0x3   :  { %7 = vsyncpa [#allocation3], 0  ;;  %v17_v5 = vadd.f32 %v16_v3, %v15_v2  ;;  %vm66_vm2 = vcmask 130048   ;;  %v90_v22 = vld [vmem:[%s189_s1] sm:$0xff]  ;;  %s157_s14 = smov [#allocation2]   ;;  %s113_s1 = sshll.u32 %s190_s2, 4  ;;  %s114_s1 = int_to_ptr.hbm [resolvable:$true] %s113_s1 }
   0x4   :  { %s111_s15 = sshll.u32 %s157_s14, 4  ;;  %vm104_vm3 = vcmask 0   ;;  %s112_s15 = int_to_ptr.vmem [resolvable:$true] %s111_s15 }
   0x5   :  { %v18_v6 = vrot.slane %v17_v5, 4 }
   0x7   :  { %v19_v7 = vadd.f32 %v18_v6, %v17_v5  ;;  %v129_v8 = vpop.eup %128 }
   0x8   :  { %v25_v10 = vmul.f32 16.0, %v129_v8  ;;  %vm29_vm1 = vweird.f32 %v129_v8 }
   0x9   :  { %v20_v9 = vrot.slane %v19_v7, 2 }
   0xa   :  { %v26_v12 = vsub.f32 1.0, %v25_v10 }
   0xb   :  { %v21_v11 = vadd.f32 %v20_v9, %v19_v7 }
   0xc   :  { %v27_v14 = vmul.f32 %v129_v8, %v26_v12 }
   0xd   :  { %v22_v13 = vrot.slane %v21_v11, 1 }
   0xe   :  { %v28_v16 = vadd.f32 %v129_v8, %v27_v14 }
   0xf   :  { %v23_v15 = vadd.f32 %v22_v13, %v21_v11 }
  0x10   :  { %v30_v17 = vsel %vm29_vm1, %v129_v8, %v28_v16 }
  0x11   :  { %v31_v18 = vmul.f32 %v30_v17, %v23_v15 }
  0x13   :  { %v32_v19 = vsub.f32 %v12_v0, %v31_v18  ;;  %v33_v20 = vsub.f32 %v13_v1, %v31_v18 }
  0x15   :  { %34 = vxpose.xlu0.b32.start [1/2] (short) (narrow) %v32_v19, 8  ;;  %84 = vmatpush.msra.mxu0 %v33_v20 }
  0x17   :  { %85 = vmatpush.msra.mxu0 %v32_v19 }
  0x1d   :  { %35 = vxpose.xlu0.b32.end [2/2] (short) (narrow) %v33_v20, 8 }
  0xb9   :  { %v50_v21 = vpop.trf.xlu0 }
  0xba   :  { %122 = vmatmul.msk.f32.vlgmr.msra.gmra.mxu0 %vm66_vm2, %v50_v21 }
 0x137   :  { %v87_v23 = vpop.f32.mrf.mxu0 }
 0x138   :  { %v91_v24 = vmul.f32 %v90_v22, %v87_v23 }
 0x13a   :  { %v92_v25 = vmul.f32 %v91_v24, %v87_v23 }
 0x13c   :  { %v93_v26 = vsel %vm14_vm0, %v92_v25, 0.0 }
 0x13d   :  { %94 = vadd.xlane.f32.xlu1 %v93_v26 }
 0x1b0   :  { %v95_v27 = vpop.xlane.xlu1 %94 }
 0x1b1   :  { %v96_v28 = vrot.slane %v95_v27, 4 }
 0x1b3   :  { %v97_v29 = vadd.f32 %v96_v28, %v95_v27 }
 0x1b5   :  { %v98_v30 = vrot.slane %v97_v29, 2 }
 0x1b7   :  { %v99_v31 = vadd.f32 %v98_v30, %v97_v29 }
 0x1b9   :  { %v100_v32 = vrot.slane %v99_v31, 1 }
 0x1bb   :  { %v101_v33 = vadd.f32 %v100_v32, %v99_v31 }
 0x1bd   :  { %123 = vpush %v101_v33 }
 0x1ee   :  { %s124_s18 = spop %123 }
 0x1ef   :  { %v103_v34 = vstv %s124_s18 }
 0x1f0   :  { %105 = vst.msk [vmem:[#allocation2] sm:$0x1] %vm104_vm3, %v103_v34 }
 0x1f1   :  { %116 = dma.vmem_to_hbm [thread:$0]  %s112_s15, 16, %s114_s1, [#allocation3]  }
 0x1f2   :  { %154 = dma.done.wait [#allocation3], 16  }
 0x1f3   :  { %155 = vsyncadd [#allocation3], 4294967280 }
 0x1f4   :  { %121 = vsyncpa [#allocation3], 1 }

// kernel: _run.2
= control target key start
LH: loop header
LB: loop body
LE: loop exit
PB: predicated region body
PF: predicated region fallthrough
CT: control target
= control target key end

     0   :  { %vm15_vm0 = vcmask 517120   ;;  %vm23_vm1 = vcmask 1024   ;;  %v34_v5 = vmov 0.0   ;;  %s65_s0 = inlined_call_operand.vmem [shape: f32[2,64], index: 0, kind: input, shape index: {}]   ;;  %s66_s1 = inlined_call_operand.vmem [shape: f32[2,64], index: 1, kind: input, shape index: {}]   ;;  %s67_s2 = inlined_call_operand.vmem [shape: f32[2,1], index: 2, kind: output, shape index: {}]  }
   0x1   :  { %v11_v0 = vld [vmem:[%s65_s0] sm:$0x3]  ;;  %24 = vst.msk [vmem:[%s67_s2] sm:$0x3] %vm23_vm1, %v34_v5 }
   0x2   :  { %v12_v1 = vld [vmem:[%s66_s1] sm:$0x3] }
   0x3   :  { %v13_v2 = vsub.f32 %v11_v0, %v12_v1 }
   0x5   :  { %v14_v3 = vmul.f32 %v13_v2, %v13_v2 }
   0x7   :  { %v16_v4 = vsel %vm15_vm0, %v14_v3, 0.0 }
   0x8   :  { %17 = vadd.xlane.f32.xlu0 %v16_v4  ;;  %v25_v6 = vld [vmem:[%s67_s2] sm:$0x3] }
  0x7b   :  { %v18_v7 = vpop.xlane.xlu0 %17 }
  0x7c   :  { %v26_v8 = vadd.f32 %v25_v6, %v18_v7 }
  0x7e   :  { %28 = vst.msk [vmem:[%s67_s2] sm:$0x3] %vm23_vm1, %v26_v8 }

</bundles_post_ra>
